<compile_context>
chip_gen: v7x
topology: tpu7x:2x2x1
jax: 0.10.0
libtpu: 0.0.40
codegen_flags: <defaults>
</compile_context>

<pallas_src>
import math

import jax
import jax.numpy as jnp
from jax.experimental import pallas as pl
from jax.experimental.pallas import tpu as pltpu


def _round_up(x, m):
    return ((x + m - 1) // m) * m


def _attention_kernel(inp_ref, enc_ref, mask_ref,
                      w_in_t_ref, w_out_ctx_t_ref, w_out_inp_t_ref,
                      out_ref, probs_ref):
    Bb, T, Din = inp_ref.shape
    _, S, Dsrc = enc_ref.shape
    Dout = out_ref.shape[-1]
    cdt = inp_ref.dtype                       # MXU operand dtype (bf16)

    inp = inp_ref[...]                        # (Bb, T, Din)
    enc = enc_ref[...]                        # (Bb, S, Dsrc)
    inp2 = inp.reshape(Bb * T, Din)           # fold batch into matmul M dim

    # x = input_project(input)                        -> (Bb*T, Dsrc), f32 acc
    x = jnp.dot(inp2, w_in_t_ref[...], preferred_element_type=jnp.float32)
    x = x.reshape(Bb, T, Dsrc).astype(cdt)

    # atten_scores = bmm(x, encoder_outputs^T)        -> (Bb, T, S), f32
    scores = jnp.einsum('btd,bsd->bts', x, enc,
                        preferred_element_type=jnp.float32)

    # masked_fill_(mask, -inf) -> additive large-negative bias (mask 1.0 == pad)
    scores = scores + mask_ref[...] * jnp.float32(-1e30)

    # softmax over encoder positions (f32 math, EUP reciprocal)
    m = jnp.max(scores, axis=-1, keepdims=True)
    e = jnp.exp(scores - m)
    denom = jnp.sum(e, axis=-1, keepdims=True)
    probs = e * pl.reciprocal(denom, approx=True)     # (Bb, T, S)

    # ctx = bmm(probs, encoder_outputs)               -> (Bb, T, Dsrc), f32 acc
    ctx = jnp.einsum('bts,bsd->btd', probs.astype(cdt), enc,
                     preferred_element_type=jnp.float32)
    ctx2 = ctx.reshape(Bb * T, Dsrc).astype(cdt)

    # out = tanh(output_project(cat(ctx, input)))     -> (Bb*T, Dout)
    out = jnp.tanh(
        jnp.dot(ctx2, w_out_ctx_t_ref[...], preferred_element_type=jnp.float32)
        + jnp.dot(inp2, w_out_inp_t_ref[...], preferred_element_type=jnp.float32))

    out_ref[...] = out.reshape(Bb, T, Dout).astype(out_ref.dtype)
    probs_ref[...] = probs.astype(probs_ref.dtype)


def _choose_block_batch(B, T, S_pad, Din, Dsrc, Dout_pad,
                        target_rows=256, vmem_budget=8 * 1024 * 1024):
    """How many batch elements to fold into one grid step."""
    per_b = (T * Din * 2 + S_pad * Dsrc * 2 + S_pad * 4
             + T * Dout_pad * 4 + T * S_pad * 4)

    def fits(bb):
        # ~double-buffered blocks must stay well inside scoped VMEM (v7x-safe).
        return 2 * bb * per_b <= vmem_budget

    divisors = [d for d in range(1, B + 1) if B % d == 0]
    feasible = [d for d in divisors if fits(d)] or [1]
    # Smallest divisor giving >= target_rows of M-work while keeping >= 2 grid
    # steps (so v7x's 2 TensorCores both get work via "parallel").
    for d in feasible:
        if d * T >= target_rows and B // d >= 2:
            return d
    multi = [d for d in feasible if B // d >= 2]
    if multi:
        return max(multi)
    return max(feasible)


def attention_layer(inp, enc_out, pad_mask, w_in, w_out,
                    compute_dtype=jnp.bfloat16):
    """Pallas implementation of AttentionLayer.forward.

    inp:      (B, T, Din)  float32   decoder states
    enc_out:  (B, S, Dsrc) float32   encoder states
    pad_mask: (B, S)       float32   1.0 == padded position (or None)
    w_in:     (Dsrc, Din)            input_project.weight
    w_out:    (Dout, Din + Dsrc)     output_project.weight
    returns:  (out (B,T,Dout), attn (B,T,S))
    """
    B, T, Din = inp.shape
    _, S, Dsrc = enc_out.shape
    Dout = w_out.shape[0]
    out_dtype = inp.dtype

    if pad_mask is None:
        pad_mask = jnp.zeros((B, S), jnp.float32)
    pad_mask = pad_mask.astype(jnp.float32)

    # Lane-dense outputs: pad S and Dout up to multiples of 128; slice after.
    S_pad = _round_up(S, 128)
    Dout_pad = _round_up(Dout, 128)

    enc_p, mask_p = enc_out, pad_mask
    if S_pad != S:
        enc_p = jnp.pad(enc_out, ((0, 0), (0, S_pad - S), (0, 0)))
        mask_p = jnp.pad(pad_mask, ((0, 0), (0, S_pad - S)), constant_values=1.0)
    mask_p = mask_p.reshape(B, 1, S_pad)

    w_out_p = jnp.asarray(w_out)
    if Dout_pad != Dout:
        w_out_p = jnp.pad(w_out_p, ((0, Dout_pad - Dout), (0, 0)))

    # Pre-transposed bf16 weights; split output projection (no in-kernel concat).
    w_in_t = jnp.asarray(w_in).T.astype(compute_dtype)        # (Din, Dsrc)
    w_out_ctx_t = w_out_p[:, :Dsrc].T.astype(compute_dtype)   # (Dsrc, Dout_pad)
    w_out_inp_t = w_out_p[:, Dsrc:].T.astype(compute_dtype)   # (Din, Dout_pad)

    inp_c = inp.astype(compute_dtype)
    enc_c = enc_p.astype(compute_dtype)

    Bb = _choose_block_batch(B, T, S_pad, Din, Dsrc, Dout_pad)
    n_steps = B // Bb

    grid_spec = pltpu.PrefetchScalarGridSpec(
        num_scalar_prefetch=0,
        grid=(n_steps,),
        in_specs=[
            pl.BlockSpec((Bb, T, Din), lambda b: (b, 0, 0)),
            pl.BlockSpec((Bb, S_pad, Dsrc), lambda b: (b, 0, 0)),
            pl.BlockSpec((Bb, 1, S_pad), lambda b: (b, 0, 0)),
            pl.BlockSpec((Din, Dsrc), lambda b: (0, 0)),
            pl.BlockSpec((Dsrc, Dout_pad), lambda b: (0, 0)),
            pl.BlockSpec((Din, Dout_pad), lambda b: (0, 0)),
        ],
        out_specs=[
            pl.BlockSpec((Bb, T, Dout_pad), lambda b: (b, 0, 0)),
            pl.BlockSpec((Bb, T, S_pad), lambda b: (b, 0, 0)),
        ],
    )

    out_p, attn_p = pl.pallas_call(
        _attention_kernel,
        out_shape=(
            jax.ShapeDtypeStruct((B, T, Dout_pad), out_dtype),
            jax.ShapeDtypeStruct((B, T, S_pad), jnp.float32),
        ),
        grid_spec=grid_spec,
        compiler_params=pltpu.CompilerParams(
            dimension_semantics=("parallel",)),
    )(inp_c, enc_c, mask_p, w_in_t, w_out_ctx_t, w_out_inp_t)

    return out_p[:, :, :Dout], attn_p[:, :, :S]


def _xavier_uniform(key, out_features, in_features):
    bound = math.sqrt(6.0 / (in_features + out_features))
    return jax.random.uniform(key, (out_features, in_features),
                              jnp.float32, -bound, bound)


def _reference(inp, enc_out, pad_mask, w_in, w_out, compute_dtype=jnp.bfloat16):
    """Pure-JAX reference mirroring the kernel's bf16-operand / f32-acc path."""
    Dsrc = enc_out.shape[-1]
    cd = compute_dtype
    inp_c = inp.astype(cd)
    enc_c = enc_out.astype(cd)
    x = jnp.einsum('btd,sd->bts', inp_c, w_in.astype(cd),
                   preferred_element_type=jnp.float32)
    scores = jnp.einsum('bts,bks->btk', x.astype(cd), enc_c,
                        preferred_element_type=jnp.float32)
    scores = scores + pad_mask[:, None, :].astype(jnp.float32) * (-1e30)
    probs = jax.nn.softmax(scores, axis=-1)
    ctx = jnp.einsum('btk,bkd->btd', probs.astype(cd), enc_c,
                     preferred_element_type=jnp.float32)
    out = jnp.tanh(
        jnp.einsum('btd,od->bto', ctx.astype(cd), w_out[:, :Dsrc].astype(cd),
                   preferred_element_type=jnp.float32)
        + jnp.einsum('btd,od->bto', inp_c, w_out[:, Dsrc:].astype(cd),
                     preferred_element_type=jnp.float32))
    return out, probs


if __name__ == "__main__":
    key = jax.random.PRNGKey(0)

    # Two deterministic configs: a tiny one matching the module's spirit, and a
    # slightly larger one that exercises the multi-batch-per-block (Bb > 1) path.
    configs = [
        dict(B=2, T=8, S=16, Din=16, Dsrc=32, Dout=24),
        dict(B=16, T=32, S=64, Din=32, Dsrc=64, Dout=48),
    ]

    for cfg in configs:
        B, T, S = cfg["B"], cfg["T"], cfg["S"]
        Din, Dsrc, Dout = cfg["Din"], cfg["Dsrc"], cfg["Dout"]

        key, k_inp, k_enc, k_win, k_wout = jax.random.split(key, 5)
        inp = jax.random.normal(k_inp, (B, T, Din), jnp.float32)
        enc_out = jax.random.normal(k_enc, (B, S, Dsrc), jnp.float32)

        # Deterministic padding mask: pad trailing positions of some batches.
        lengths = jnp.maximum(S - 4 * (jnp.arange(B) % 3), 1).astype(jnp.int32)
        pad_mask = (jnp.arange(S)[None, :] >= lengths[:, None]).astype(jnp.float32)

        # Parameters (xavier_uniform, bias=False), as in the PyTorch __init__.
        w_in = _xavier_uniform(k_win, Dsrc, Din)               # (Dsrc, Din)
        w_out = _xavier_uniform(k_wout, Dout, Din + Dsrc)      # (Dout, Din+Dsrc)

        out, attn = attention_layer(inp, enc_out, pad_mask, w_in, w_out)
        out = jax.block_until_ready(out)
        attn = jax.block_until_ready(attn)

        out_ref, attn_ref = _reference(inp, enc_out, pad_mask, w_in, w_out)
        assert out.shape == (B, T, Dout) and attn.shape == (B, T, S)
        assert jnp.all(jnp.isfinite(out)) and jnp.all(jnp.isfinite(attn))
        assert jnp.allclose(out, out_ref, atol=1e-2, rtol=1e-2)
        assert jnp.allclose(attn, attn_ref, atol=1e-2, rtol=1e-2)

    print("KERNEL_OK")
</pallas_src>

<mosaic_0001>
module attributes {stable_mosaic.version = 11 : i64} {
  func.func @_attention_kernel(%arg0: i32, %arg1: memref<1x8x16xbf16, #tpu.memory_space<vmem>>, %arg2: memref<1x128x32xbf16, #tpu.memory_space<vmem>>, %arg3: memref<1x1x128xf32, #tpu.memory_space<vmem>>, %arg4: memref<16x32xbf16, #tpu.memory_space<vmem>>, %arg5: memref<32x128xbf16, #tpu.memory_space<vmem>>, %arg6: memref<16x128xbf16, #tpu.memory_space<vmem>>, %arg7: memref<1x8x128xf32, #tpu.memory_space<vmem>>, %arg8: memref<1x8x128xf32, #tpu.memory_space<vmem>>) attributes {dimension_semantics = [#tpu.dimension_semantics<parallel>], iteration_bounds = array<i64: 2>, scalar_prefetch = 0 : i64, scratch_operands = 0 : i64, tpu.core_type = #tpu.core_type<tc>, window_params = [{transform_indices = @transform_0, window_bounds = array<i64: 1, 8, 16>}, {transform_indices = @transform_1, window_bounds = array<i64: 1, 128, 32>}, {transform_indices = @transform_2, window_bounds = array<i64: 1, 1, 128>}, {pipeline_mode = #tpu.pipeline_mode<synchronous>, transform_indices = @transform_3, window_bounds = array<i64: 16, 32>}, {pipeline_mode = #tpu.pipeline_mode<synchronous>, transform_indices = @transform_4, window_bounds = array<i64: 32, 128>}, {pipeline_mode = #tpu.pipeline_mode<synchronous>, transform_indices = @transform_5, window_bounds = array<i64: 16, 128>}, {transform_indices = @transform_6, window_bounds = array<i64: 1, 8, 128>}, {transform_indices = @transform_7, window_bounds = array<i64: 1, 8, 128>}]} {
    %c0 = arith.constant 0 : index
    %c0_0 = arith.constant 0 : index
    %c0_1 = arith.constant 0 : index
    %0 = vector.load %arg1[%c0, %c0_0, %c0_1] : memref<1x8x16xbf16, #tpu.memory_space<vmem>>, vector<1x8x16xbf16>
    %c0_2 = arith.constant 0 : index
    %c0_3 = arith.constant 0 : index
    %c0_4 = arith.constant 0 : index
    %1 = vector.load %arg2[%c0_2, %c0_3, %c0_4] : memref<1x128x32xbf16, #tpu.memory_space<vmem>>, vector<1x128x32xbf16>
    %2 = vector.shape_cast %0 : vector<1x8x16xbf16> to vector<8x16xbf16>
    %c0_5 = arith.constant 0 : index
    %c0_6 = arith.constant 0 : index
    %3 = vector.load %arg4[%c0_5, %c0_6] : memref<16x32xbf16, #tpu.memory_space<vmem>>, vector<16x32xbf16>
    %cst = arith.constant dense<0.000000e+00> : vector<8x32xf32>
    %4 = tpu.matmul %2, %3, %cst {dimension_numbers = #tpu.dot_dimension_numbers<[1], [0], [0], [1], [0, 0, 1, 1], [], []>} : vector<8x16xbf16>, vector<16x32xbf16>, vector<8x32xf32> -> vector<8x32xf32>
    %5 = vector.shape_cast %4 : vector<8x32xf32> to vector<1x8x32xf32>
    %6 = arith.truncf %5 : vector<1x8x32xf32> to vector<1x8x32xbf16>
    "tpu.trace_start"() <{level = 10 : i32, message = "btd,bsd->bts"}> : () -> ()
    %cst_7 = arith.constant dense<0.000000e+00> : vector<1x8x128xf32>
    %7 = tpu.matmul %6, %1, %cst_7 {dimension_numbers = #tpu.dot_dimension_numbers<[2], [2], [1], [1], [0, 0, 0, 1, 1, 1], [0], [0]>} : vector<1x8x32xbf16>, vector<1x128x32xbf16>, vector<1x8x128xf32> -> vector<1x8x128xf32>
    "tpu.trace_stop"() : () -> ()
    %c0_8 = arith.constant 0 : index
    %c0_9 = arith.constant 0 : index
    %c0_10 = arith.constant 0 : index
    %8 = vector.load %arg3[%c0_8, %c0_9, %c0_10] : memref<1x1x128xf32, #tpu.memory_space<vmem>>, vector<1x1x128xf32>
    %cst_11 = arith.constant -1.000000e+30 : f32
    %9 = vector.broadcast %cst_11 : f32 to vector<1x1x128xf32>
    %10 = arith.mulf %8, %9 : vector<1x1x128xf32>
    %11 = vector.broadcast %10 : vector<1x1x128xf32> to vector<1x8x128xf32>
    %12 = arith.addf %7, %11 : vector<1x8x128xf32>
    %cst_12 = arith.constant dense<0xFF800000> : vector<1x8xf32>
    %13 = vector.multi_reduction <maximumf>, %12, %cst_12 [2] : vector<1x8x128xf32> to vector<1x8xf32>
    %14 = vector.shape_cast %13 : vector<1x8xf32> to vector<1x8x1xf32>
    %15 = vector.broadcast %14 : vector<1x8x1xf32> to vector<1x8x128xf32>
    %16 = arith.subf %12, %15 : vector<1x8x128xf32>
    %17 = math.exp %16 : vector<1x8x128xf32>
    %cst_13 = arith.constant dense<0.000000e+00> : vector<1x8xf32>
    %18 = vector.multi_reduction <add>, %17, %cst_13 [2] : vector<1x8x128xf32> to vector<1x8xf32>
    %19 = vector.shape_cast %18 : vector<1x8xf32> to vector<1x8x1xf32>
    %20 = tpu.reciprocal %19 {approx = true} : vector<1x8x1xf32> -> vector<1x8x1xf32>
    %21 = vector.broadcast %20 : vector<1x8x1xf32> to vector<1x8x128xf32>
    %22 = arith.mulf %17, %21 : vector<1x8x128xf32>
    %23 = arith.truncf %22 : vector<1x8x128xf32> to vector<1x8x128xbf16>
    "tpu.trace_start"() <{level = 10 : i32, message = "bts,bsd->btd"}> : () -> ()
    %cst_14 = arith.constant dense<0.000000e+00> : vector<1x8x32xf32>
    %24 = tpu.matmul %23, %1, %cst_14 {dimension_numbers = #tpu.dot_dimension_numbers<[2], [1], [1], [2], [0, 0, 0, 1, 1, 2], [0], [0]>} : vector<1x8x128xbf16>, vector<1x128x32xbf16>, vector<1x8x32xf32> -> vector<1x8x32xf32>
    "tpu.trace_stop"() : () -> ()
    %25 = vector.shape_cast %24 : vector<1x8x32xf32> to vector<8x32xf32>
    %26 = arith.truncf %25 : vector<8x32xf32> to vector<8x32xbf16>
    %c0_15 = arith.constant 0 : index
    %c0_16 = arith.constant 0 : index
    %27 = vector.load %arg5[%c0_15, %c0_16] : memref<32x128xbf16, #tpu.memory_space<vmem>>, vector<32x128xbf16>
    %cst_17 = arith.constant dense<0.000000e+00> : vector<8x128xf32>
    %28 = tpu.matmul %26, %27, %cst_17 {dimension_numbers = #tpu.dot_dimension_numbers<[1], [0], [0], [1], [0, 0, 1, 1], [], []>} : vector<8x32xbf16>, vector<32x128xbf16>, vector<8x128xf32> -> vector<8x128xf32>
    %c0_18 = arith.constant 0 : index
    %c0_19 = arith.constant 0 : index
    %29 = vector.load %arg6[%c0_18, %c0_19] : memref<16x128xbf16, #tpu.memory_space<vmem>>, vector<16x128xbf16>
    %cst_20 = arith.constant dense<0.000000e+00> : vector<8x128xf32>
    %30 = tpu.matmul %2, %29, %cst_20 {dimension_numbers = #tpu.dot_dimension_numbers<[1], [0], [0], [1], [0, 0, 1, 1], [], []>} : vector<8x16xbf16>, vector<16x128xbf16>, vector<8x128xf32> -> vector<8x128xf32>
    %31 = arith.addf %28, %30 : vector<8x128xf32>
    %32 = math.tanh %31 : vector<8x128xf32>
    %33 = vector.shape_cast %32 : vector<8x128xf32> to vector<1x8x128xf32>
    %c0_21 = arith.constant 0 : index
    %c0_22 = arith.constant 0 : index
    %c0_23 = arith.constant 0 : index
    %34 = vector.load %arg7[%c0_21, %c0_22, %c0_23] : memref<1x8x128xf32, #tpu.memory_space<vmem>>, vector<1x8x128xf32>
    tpu.vector_store %arg7[%c0_21, %c0_22, %c0_23], %33 {strides = array<i32>} : memref<1x8x128xf32, #tpu.memory_space<vmem>>, vector<1x8x128xf32>,
    %c0_24 = arith.constant 0 : index
    %c0_25 = arith.constant 0 : index
    %c0_26 = arith.constant 0 : index
    %35 = vector.load %arg8[%c0_24, %c0_25, %c0_26] : memref<1x8x128xf32, #tpu.memory_space<vmem>>, vector<1x8x128xf32>
    tpu.vector_store %arg8[%c0_24, %c0_25, %c0_26], %22 {strides = array<i32>} : memref<1x8x128xf32, #tpu.memory_space<vmem>>, vector<1x8x128xf32>,
    return
  }
  func.func @transform_0(%arg0: i32) -> (i32, i32, i32) {
    %c0_i32 = arith.constant 0 : i32
    %c0_i32_0 = arith.constant 0 : i32
    %c0_i32_1 = arith.constant 0 : i32
    return %arg0, %c0_i32, %c0_i32_0 : i32, i32, i32
  }
  func.func @transform_1(%arg0: i32) -> (i32, i32, i32) {
    %c0_i32 = arith.constant 0 : i32
    %c0_i32_0 = arith.constant 0 : i32
    %c0_i32_1 = arith.constant 0 : i32
    return %arg0, %c0_i32, %c0_i32_0 : i32, i32, i32
  }
  func.func @transform_2(%arg0: i32) -> (i32, i32, i32) {
    %c0_i32 = arith.constant 0 : i32
    %c0_i32_0 = arith.constant 0 : i32
    %c0_i32_1 = arith.constant 0 : i32
    return %arg0, %c0_i32, %c0_i32_0 : i32, i32, i32
  }
  func.func @transform_3(%arg0: i32) -> (i32, i32) {
    %c0_i32 = arith.constant 0 : i32
    %c0_i32_0 = arith.constant 0 : i32
    %c0_i32_1 = arith.constant 0 : i32
    return %c0_i32, %c0_i32_0 : i32, i32
  }
  func.func @transform_4(%arg0: i32) -> (i32, i32) {
    %c0_i32 = arith.constant 0 : i32
    %c0_i32_0 = arith.constant 0 : i32
    %c0_i32_1 = arith.constant 0 : i32
    return %c0_i32, %c0_i32_0 : i32, i32
  }
  func.func @transform_5(%arg0: i32) -> (i32, i32) {
    %c0_i32 = arith.constant 0 : i32
    %c0_i32_0 = arith.constant 0 : i32
    %c0_i32_1 = arith.constant 0 : i32
    return %c0_i32, %c0_i32_0 : i32, i32
  }
  func.func @transform_6(%arg0: i32) -> (i32, i32, i32) {
    %c0_i32 = arith.constant 0 : i32
    %c0_i32_0 = arith.constant 0 : i32
    %c0_i32_1 = arith.constant 0 : i32
    return %arg0, %c0_i32, %c0_i32_0 : i32, i32, i32
  }
  func.func @transform_7(%arg0: i32) -> (i32, i32, i32) {
    %c0_i32 = arith.constant 0 : i32
    %c0_i32_0 = arith.constant 0 : i32
    %c0_i32_1 = arith.constant 0 : i32
    return %arg0, %c0_i32, %c0_i32_0 : i32, i32, i32
  }
}

</mosaic_0001>

<bundles_post_ra>
// kernel: tpu_custom_call.1
= control target key start
LH: loop header
LB: loop body
LE: loop exit
PB: predicated region body
PF: predicated region fallthrough
CT: control target
= control target key end

     0   :  { %13 = vsyncpa [#allocation3], 0  ;;  %s1358_s0 = inlined_call_operand.vmem [shape: bf16[2,8,16], index: 0, kind: input, shape index: {}]   ;;  %s1359_s1 = inlined_call_operand.vmem [shape: bf16[2,128,32], index: 1, kind: input, shape index: {}]   ;;  %s1360_s2 = inlined_call_operand.vmem [shape: f32[2,1,128], index: 2, kind: input, shape index: {}]   ;;  %s1361_s3 = inlined_call_operand.vmem [shape: bf16[16,32], index: 3, kind: input, shape index: {}]   ;;  %s1362_s4 = inlined_call_operand.vmem [shape: bf16[32,128], index: 4, kind: input, shape index: {}]   ;;  %s1363_s5 = inlined_call_operand.vmem [shape: bf16[16,128], index: 5, kind: input, shape index: {}]   ;;  %s1364_s6 = inlined_call_operand.hbm [shape: f32[2,8,128], index: 6, kind: output, shape index: {0}]   ;;  %s1365_s7 = inlined_call_operand.hbm [shape: f32[2,8,128], index: 7, kind: output, shape index: {1}]  }
   0x1   :  { %15 = vsyncpa [#allocation3 + $0x1], 0 }
   0x2   :  { %16 = vsyncpa [#allocation5], 0 }
   0x3   :  { %18 = vsyncpa [#allocation5 + $0x1], 0  ;;  %s1144_s24 = smov 0   ;;  %s1146_s25 = smov 0  }
   0x4   :  { %s1148_s26 = smov 0   ;;  %s1150_s27 = smov 0  }
   0x5 LB: > { %s1165_s28 = sadd.s32 4294967295, %s1098_s27   ;;  %s819_s29 = sadd.s32 4294967294, %s1098_s27   ;;  %s1098_s27 = sphi %s1150_s27, %s1371_s27   ;;  %s1094_s26 = sphi %s1148_s26, %s1370_s26   ;;  %s1090_s25 = sphi %s1146_s25, %s1369_s25   ;;  %s1086_s24 = sphi %s1144_s24, %s1368_s24  }
   0x6   : > { %s1169_s30 = sadd.s32 1, %s1098_s27   ;;  %s172_s8 = sadd.s32 1, %s1094_s26 }
   0x7   : > { %s169_s9 = ssub.s32 %s1098_s27, %s1169_s30  ;;  %p182_p0 = scmp.ne.s32.totalorder %s1094_s26, %s1090_s25 }
   0x8   : > { %p170_p1 = scmp.eq.s32.totalorder %s169_s9, 0  ;;  %p183_p2 = scmp.eq.s32.totalorder %s1165_s28, 1 }
   0x9   : > { %p188_p3 = scmp.ne.s32.totalorder %s1090_s25, %s1086_s24  ;;  %p189_p4 = scmp.eq.s32.totalorder %s819_s29, 1 }
   0xa   : > { %s1180_s10 = scalar_select %p170_p1, %s1094_s26, %s172_s8  }
   0xb   : > { %p1182_p5 = por %p183_p2, %p182_p0  ;;  %p1186_p6 = por %p189_p4, %p188_p3 }
   0xc   : > { %p822_p7 = scmp.ge.s32.totalorder %s1098_s27, 1  ;;  %p263_p8 = scmp.lt.s32.totalorder %s1098_s27, 3 }
   0xe   : > { %p264_p9 = pnand %p822_p7, %p263_p8 }
   0xf   : > { %v986_v0 = vld [vmem:[%s1361_s3] sm:$0xff] (!%p264_p9)   ;;  %v1100_v1 = vmov (!%p264_p9), 0.0   ;;  %p307_p10 = scmp.lt.s32.totalorder (!%p264_p9), %s1165_s28, 1  ;;  %vm1101_vm0 = vmmov (!%p264_p9), 0   ;;  %vm345_vm1 = vcmask (!%p264_p9), 130048   ;;  %vm438_vm2 = vcmask (!%p264_p9), 261120  }
  0x10   : > { %267 = sbr.rel (%p264_p9) target bundleno = 1221 (0x4c5), region = 44  ;;  %876 = vmatprep.subr.bf16.mxu0 (!%p264_p9), %v1100_v1  ;;  %882 = vmatprep.subr.bf16.mxu1 (!%p264_p9), %v1100_v1  ;;  %v393_v24 = vlaneseq (!%p264_p9)  ;;  %s1259_s13 = sand.u32 (!%p264_p9), 1, %s1090_s25   ;;  %v995_v42 = vld [vmem:[%s1363_s5] sm:$0xff] (!%p264_p9)   ;;  %v997_v45 = vld [vmem:[%s1362_s4 + $0x8] sm:$0xff] (!%p264_p9)  }
  0x11   : > { %877 = vmatpush3.bf16.msra.mxu0 (!%p264_p9), %v986_v0  ;;  %878 = vmatprep.mubr.msk.bf16.mxu0 (!%p264_p9), %vm1101_vm0, %v1100_v1  ;;  %s823_s14 = sshll.u32 (!%p264_p9), %s1259_s13, 3  ;;  %v996_v44 = vld [vmem:[%s1362_s4] sm:$0xff] (!%p264_p9)   ;;  %s846_s22 = sshll.u32 (!%p264_p9), %s1165_s28, 7 }
  0x12   : > { %898 = vmatprep.mubr.msk.bf16.mxu1 (!%p264_p9), %vm1101_vm0, %v1100_v1  ;;  %902 = vmatprep.subr.bf16.mxu0 (!%p264_p9), %v1100_v1  ;;  %v394_v25 = vshrl.u32 (!%p264_p9), %v393_v24, 7  ;;  %s1288_s8 = scalar_lea.hbm (!%p264_p9), %s1365_s7, %s846_s22  ;;  %s1102_s18 = smov (!%p264_p9), [#allocation4]  }
  0x13   : > { %s1008_s19 = sshll.u32 (!%p264_p9), %s1102_s18, 4  ;;  %s1009_s19 = int_to_ptr.vmem [resolvable:$false] %s1008_s19 }
  0x14   : > { %v395_v28 = vsub.s32 (!%p264_p9), 0, %v394_v25 }
  0x17   : > { %s1201_s15 = scalar_select %p307_p10, %s1165_s28, 1 }
  0x19   : > { %s825_s16 = sshll.u32 %s1201_s15, 2  ;;  %s850_s17 = sshll.u32 %s1201_s15, 6 }
  0x1a   : > { %s310_s20 = scalar_lea.vmem %s1358_s0, %s825_s16  ;;  %s1214_s23 = scalar_lea.vmem %s1359_s1, %s850_s17 }
  0x1b   : > { %v1216_v2 = vld [vmem:[%s310_s20] sm:$0xf]  ;;  %v988_v5 = vld [vmem:[%s1214_s23 + $0x8] sm:$0xff]   ;;  %v989_v7 = vld [vmem:[%s1214_s23 + $0x10] sm:$0xff]   ;;  %s318_s9 = scalar_lea.vmem %s1360_s2, %s1201_s15  ;;  %s306_s17 = scalar_lea.vmem [#allocation4], %s823_s14 }
  0x1c   : > { %879 = vmatmul.mubr.msk.bf16.vlgmr.msra.gmra.mrb[0].mxu0 %vm345_vm1, %v1216_v2  ;;  %v987_v3 = vld [vmem:[%s1214_s23] sm:$0xff]   ;;  %v446_v6 = vsel %vm438_vm2, %v988_v5, 0  ;;  %v990_v8 = vld [vmem:[%s1214_s23 + $0x18] sm:$0xff]   ;;  %v449_v9 = vsel %vm438_vm2, %v989_v7, 0  ;;  %v992_v11 = vld [vmem:[%s1214_s23 + $0x28] sm:$0xff]   ;;  %s681_s15 = scalar_lea.sflag [#allocation5], %s1259_s13 }
  0x1d   : > { %918 = vmatprep.mubr.msk.bf16.mxu0 %vm1101_vm0, %v1100_v1  ;;  %v443_v4 = vsel %vm438_vm2, %v987_v3, 0  ;;  %903 = vmatpush3.bf16.msra.mxu0 %v987_v3  ;;  %v991_v10 = vld [vmem:[%s1214_s23 + $0x20] sm:$0xff]   ;;  %v452_v12 = vsel %vm438_vm2, %v990_v8, 0  ;;  %v993_v13 = vld [vmem:[%s1214_s23 + $0x30] sm:$0xff]   ;;  %v994_v14 = vld [vmem:[%s1214_s23 + $0x38] sm:$0xff]   ;;  %v458_v16 = vsel %vm438_vm2, %v992_v11, 0 }
  0x1e   : > { %883 = vmatpush3.bf16.xpose.msra.mxu1 %v443_v4  ;;  %904 = vmatprep.subr.bf16.mxu0 %v1100_v1  ;;  %v455_v15 = vsel %vm438_vm2, %v991_v10, 0  ;;  %v461_v17 = vsel %vm438_vm2, %v993_v13, 0  ;;  %v464_v18 = vsel %vm438_vm2, %v994_v14, 0  ;;  %v390_v26 = vld [vmem:[%s318_s9] sm:$0x1]  ;;  %s707_s9 = sshll.u32 %s306_s17, 4  ;;  %s708_s9 = int_to_ptr.vmem [resolvable:$true] %s707_s9 }
  0x1f   : > { %884 = vmatprep.subr.bf16.mxu1 %v1100_v1  ;;  %v391_v27 = vmul.f32 -1e+30, %v390_v26  ;;  %s1004_s16 = scalar_lea.vmem %s708_s9, 128  ;;  %s1010_s20 = scalar_lea.vmem %s1009_s19, 256 }
  0x20   : > { %p1005_p11 = scmp.ne.s32.totalorder %s708_s9, %s1004_s16  ;;  %p1011_p0 = scmp.lt.s32.totalorder %s708_s9, %s1009_s19 }
  0x21   : > { %905 = vmatpush3.bf16.msra.mxu0 %v988_v5  ;;  %v396_v29 = vrot.slane %v391_v27, %v395_v28  ;;  %p1012_p1 = scmp.lt.s32.totalorder %s1010_s20, %s1004_s16 }
  0x22   : > { %906 = vmatprep.subr.bf16.mxu0 %v1100_v1  ;;  %p1006_p12 = pnand %p1005_p11, %p1182_p5 }
  0x23   : > { %p1013_p2 = por %p1012_p1, %p1011_p0 }
  0x24   : > { %p1007_p13 = pneg %p1006_p12 }
  0x25   : > { %907 = vmatpush3.bf16.msra.mxu0 %v989_v7 }
  0x26   : > { %885 = vmatpush3.bf16.xpose.msra.mxu1 %v446_v6  ;;  %908 = vmatprep.subr.bf16.mxu0 %v1100_v1  ;;  %p1014_p3 = pnand %p1013_p2, %p1007_p13 }
  0x27   : > { %886 = vmatprep.subr.bf16.mxu1 %v1100_v1 }
  0x29   : > { %909 = vmatpush3.bf16.msra.mxu0 %v990_v8 }
  0x2a   : > { %910 = vmatprep.subr.bf16.mxu0 %v1100_v1 }
  0x2d   : > { %911 = vmatpush3.bf16.msra.mxu0 %v991_v10 }
  0x2e   : > { %887 = vmatpush3.bf16.xpose.msra.mxu1 %v449_v9  ;;  %912 = vmatprep.subr.bf16.mxu0 %v1100_v1 }
  0x2f   : > { %888 = vmatprep.subr.bf16.mxu1 %v1100_v1 }
  0x31   : > { %913 = vmatpush3.bf16.msra.mxu0 %v992_v11 }
  0x32   : > { %914 = vmatprep.subr.bf16.mxu0 %v1100_v1 }
  0x35   : > { %915 = vmatpush3.bf16.msra.mxu0 %v993_v13 }
  0x36   : > { %889 = vmatpush3.bf16.xpose.msra.mxu1 %v452_v12  ;;  %916 = vmatprep.subr.bf16.mxu0 %v1100_v1 }
  0x37   : > { %890 = vmatprep.subr.bf16.mxu1 %v1100_v1 }
  0x39   : > { %917 = vmatpush3.bf16.msra.mxu0 %v994_v14 }
  0x3a   : > { %922 = vmatprep.subr.bf16.mxu0 %v1100_v1 }
  0x3e   : > { %891 = vmatpush3.bf16.xpose.msra.mxu1 %v455_v15 }
  0x3f   : > { %892 = vmatprep.subr.bf16.mxu1 %v1100_v1 }
  0x46   : > { %893 = vmatpush3.bf16.xpose.msra.mxu1 %v458_v16 }
  0x47   : > { %894 = vmatprep.subr.bf16.mxu1 %v1100_v1 }
  0x4e   : > { %895 = vmatpush3.bf16.xpose.msra.mxu1 %v461_v17 }
  0x4f   : > { %896 = vmatprep.subr.bf16.mxu1 %v1100_v1 }
  0x56   : > { %897 = vmatpush3.bf16.xpose.msra.mxu1 %v464_v18 }
  0xef   : > { %v383_v19 = vpop.f32.mrb[0].mxu0 }
  0xf0   : > { %v389_v20 = vpack.c.bf16 %v383_v19, %v383_v19  ;;  %v880_v21 = vpop.f32.mrb[1].mxu0 }
  0xf1   : > { %v386_v22 = vpop.f32.mrb[2].mxu0 }
  0xf2   : > { %v881_v23 = vpop.f32.mrb[3].mxu0  ;;  %899 = vmatmul.mubr.msk.bf16.vlgmr.msra.gmra.mrb[0].mxu1 %vm438_vm2, %v389_v20 }
 0x1c5   : > { %v500_v30 = vpop.f32.mrb[0].mxu1 }
 0x1c6   : > { %v501_v31 = vadd.f32 %v500_v30, %v396_v29  ;;  %v900_v32 = vpop.f32.mrb[1].mxu1 }
 0x1c7   : > { %v503_v33 = vpop.f32.mrb[2].mxu1 }
 0x1c8   : > { %506 = vmax.xlane.f32.xlu0 %v501_v31  ;;  %v901_v34 = vpop.f32.mrb[3].mxu1 }
 0x255   : > { %v507_v35 = vpop.xlane.xlu0 %506 }
 0x256   : > { %v508_v36 = vsub.f32 %v501_v31, %v507_v35 }
 0x258   : > { %v509_v37 = vmul.f32 1.442695, %v508_v36 }
 0x25a   : > { %998 = vpow2.f32 %v509_v37 }
 0x264   : > { %v999_v38 = vpop.eup %998 }
 0x265   : > { %511 = vadd.xlane.f32.xlu0 %v999_v38 }
 0x2f2   : > { %v512_v39 = vpop.xlane.xlu0 %511 }
 0x2f3   : > { %1000 = vrcp.f32 %v512_v39 }
 0x2fd   : > { %v1001_v40 = vpop.eup %1000 }
 0x2fe   : > { %v514_v41 = vmul.f32 %v1001_v40, %v999_v38 }
 0x300   : > { %v515_v43 = vpack.c.bf16 %v514_v41, %v514_v41  ;;  %674 = vst [vmem:[%s306_s17] sm:$0xff] %v514_v41 }
 0x302   : > { %919 = vmatmul.mubr.bf16.vlgmr.msra.gmra.mrb[4].mxu0 %v515_v43 }
 0x303   : > { %923 = vmatpush3.bf16.msra.mxu0 %v995_v42  ;;  %924 = vmatprep.mubr.msk.bf16.mxu0 %vm1101_vm0, %v1100_v1 }
 0x304   : > { %928 = vmatprep.subr.bf16.mxu0 %v1100_v1 }
 0x30a   : > { %925 = vmatmul.mubr.msk.bf16.vlgmr.msra.gmra.mrb[8].mxu0 %vm345_vm1, %v1216_v2 }
 0x30b   : > { %929 = vmatpush3.bf16.msra.mxu0 %v996_v44  ;;  %932 = vmatprep.mubr.msk.bf16.mxu0 %vm1101_vm0, %v1100_v1 }
 0x30c   : > { %930 = vmatprep.subr.bf16.mxu0 %v1100_v1 }
 0x30f   : > { %931 = vmatpush3.bf16.msra.mxu0 %v997_v45 }
 0x3d5   : > { %v558_v46 = vpop.f32.mrb[4].mxu0 }
 0x3d6   : > { %v564_v47 = vpack.c.bf16 %v558_v46, %v558_v46  ;;  %v920_v48 = vpop.f32.mrb[5].mxu0 }
 0x3d7   : > { %v561_v49 = vpop.f32.mrb[6].mxu0 }
 0x3d8   : > { %v921_v50 = vpop.f32.mrb[7].mxu0  ;;  %933 = vmatmul.mubr.msk.bf16.vlgmr.msra.gmra.mrb[8].mxu0 %vm438_vm2, %v564_v47 }
 0x3d9   : > { %1017 = shalt.err (!%p1014_p3)
}
 0x3da   : > { %s1018_s17 = scalar_lea.hbm %s1288_s8, 128  ;;  %s1022_s29 = scalar_lea.hbm %s1365_s7, 256 }
 0x3db   : > { %p1019_p4 = scmp.ne.s32.totalorder %s1288_s8, %s1018_s17  ;;  %p1023_p9 = scmp.lt.u32.totalorder %s1288_s8, %s1365_s7 }
 0x3dc   : > { %p1024_p10 = scmp.lt.u32.totalorder %s1022_s29, %s1018_s17  ;;  %p1026_p12 = scmp.lt.u32.totalorder %s1018_s17, %s1288_s8 }
 0x3dd   : > { %p1020_p7 = pnand %p1019_p4, %p1182_p5 }
 0x3de   : > { %p1025_p11 = por %p1024_p10, %p1023_p9 }
 0x3df   : > { %p1021_p8 = pneg %p1020_p7 }
 0x3e0   : > { %p1027_p13 = por %p1026_p12, %p1025_p11 }
 0x3e2   : > { %p1028_p0 = pnand %p1027_p13, %p1021_p8 }
 0x3e4   : > { %1031 = shalt.err (!%p1028_p0)
}
 0x3e5   : > { %941 = dma.vmem_to_hbm [thread:$0]  (%p1182_p5), %s708_s9, 128, %s1288_s8, %s681_s15  }
 0x3e6   : > { %s299_s16 = scalar_lea.vmem [#allocation2], %s823_s14  ;;  %s1315_s23 = scalar_lea.hbm %s1364_s6, %s846_s22 }
 0x3e7   : > { %s694_s20 = sshll.u32 %s299_s16, 4  ;;  %s676_s8 = scalar_lea.sflag [#allocation3], %s1259_s13  ;;  %s1317_s20 = int_to_ptr.vmem [resolvable:$true] %s694_s20 }
 0x3e8   : > { %s1032_s9 = scalar_lea.vmem %s1317_s20, 128  ;;  %s1103_s14 = smov [#allocation2]  }
 0x3e9   : > { %p1033_p1 = scmp.ne.s32.totalorder %s1317_s20, %s1032_s9  ;;  %s1036_s28 = sshll.u32 %s1103_s14, 4  ;;  %s1037_s28 = int_to_ptr.vmem [resolvable:$false] %s1036_s28 }
 0x3ea   : > { %s1038_s15 = scalar_lea.vmem %s1037_s28, 256  ;;  %p1039_p4 = scmp.lt.s32.totalorder %s1317_s20, %s1037_s28 }
 0x3eb   : > { %p1034_p2 = pnand %p1033_p1, %p1182_p5  ;;  %p1040_p7 = scmp.lt.s32.totalorder %s1038_s15, %s1032_s9 }
 0x3ed   : > { %p1035_p3 = pneg %p1034_p2  ;;  %p1041_p8 = por %p1040_p7, %p1039_p4 }
 0x3ef   : > { %p1042_p9 = pnand %p1041_p8, %p1035_p3 }
 0x4ab   : > { %v666_v51 = vpop.f32.mrb[8].mxu0 }
 0x4ac   : > { %1002 = vtanh.f32 %v666_v51  ;;  %v934_v52 = vpop.f32.mrb[9].mxu0 }
 0x4ad   : > { %v669_v53 = vpop.f32.mrb[10].mxu0 }
 0x4ae   : > { %v935_v54 = vpop.f32.mrb[11].mxu0 }
 0x4b6   : > { %v1003_v55 = vpop.eup %1002 }
 0x4b7   : > { %673 = vst [vmem:[%s299_s16] sm:$0xff] %v1003_v55 }
 0x4b8   : > { %1045 = shalt.err (!%p1042_p9)
}
 0x4b9   : > { %s1046_s13 = scalar_lea.hbm %s1315_s23, 128  ;;  %s1050_s18 = scalar_lea.hbm %s1364_s6, 256 }
 0x4ba   : > { %p1047_p10 = scmp.ne.s32.totalorder %s1315_s23, %s1046_s13  ;;  %p1051_p13 = scmp.lt.u32.totalorder %s1315_s23, %s1364_s6 }
 0x4bb   : > { %p1052_p0 = scmp.lt.u32.totalorder %s1050_s18, %s1046_s13  ;;  %p1054_p2 = scmp.lt.u32.totalorder %s1046_s13, %s1315_s23 }
 0x4bc   : > { %p1048_p11 = pnand %p1047_p10, %p1182_p5 }
 0x4bd   : > { %p1053_p1 = por %p1052_p0, %p1051_p13 }
 0x4be   : > { %p1049_p12 = pneg %p1048_p11 }
 0x4bf   : > { %p1055_p3 = por %p1054_p2, %p1053_p1 }
 0x4c1   : > { %p1056_p4 = pnand %p1055_p3, %p1049_p12 }
 0x4c3   : > { %1059 = shalt.err (!%p1056_p4)
}
 0x4c4   : > { %940 = dma.vmem_to_hbm [thread:$0]  (%p1182_p5), %s1317_s20, 128, %s1315_s23, %s676_s8  }
 0x4c5 PF: > { %p951_p7 = scmp.ge.s32.totalorder %s1098_s27, 2  ;;  %s719_s17 = sand.u32 1, %s1086_s24  }
 0x4c6   : > { %s720_s21 = scalar_lea.sflag [#allocation3], %s719_s17 }
 0x4c7   : > { %p945_p8 = pnand %p951_p7, %p1186_p6 }
 0x4c9   : > { %1077 = dma.done.wait (!%p945_p8), %s720_s21, 128  }
 0x4ca   : > { %1079 = vsyncadd (!%p945_p8), %s720_s21, 4294967168  ;;  %s729_s9 = scalar_lea.sflag [#allocation5], %s719_s17 }
 0x4cb   : > { %1081 = dma.done.wait (!%p945_p8), %s729_s9, 128  }
 0x4cc   : > { %1083 = vsyncadd (!%p945_p8), %s729_s9, 4294967168  ;;  %p21_p5 = scmp.ge.s32.totalorder %s1169_s30, 4   ;;  %s1368_s24 = smov %s1090_s25 }
 0x4cd   : > { %s1369_s25 = smov %s1094_s26  ;;  %s1370_s26 = smov %s1180_s10 }
 0x4ce   : > { %s1371_s27 = smov %s1169_s30  ;;  %23 = sbr.rel (!%p21_p5) target bundleno = 5 (0x5), region = 102 }
 0x4d5   :  { %734 = vsyncpa [#allocation3], 1 }
 0x4d6   :  { %736 = vsyncpa [#allocation3 + $0x1], 1 }
 0x4d7   :  { %737 = vsyncpa [#allocation5], 1 }
 0x4d8   :  { %739 = vsyncpa [#allocation5 + $0x1], 1 }

</bundles_post_ra>
